<compile_context>
chip_gen: v5e
topology: v5e:2x2
jax: 0.10.0
libtpu: 0.0.40
codegen_flags: <defaults>
</compile_context>

<pallas_src>
import functools
import math

import jax
import jax.numpy as jnp
from jax import lax
from jax.experimental import pallas as pl
from jax.experimental.pallas import tpu as pltpu


_LANE = 128
_SUBLANE = 8
_NEIGHBOR_SLAB = _SUBLANE          # slab width for the large-neighbor reduce
_DIRECT_REDUCE_MAX_NEIGHBORS = 32  # sub-f32 inputs: above this, reduce in slabs


def _round_up(x, m):
    return ((x + m - 1) // m) * m


def _cdiv(a, b):
    return -(-a // b)


def _device_kind():
    try:
        return jax.devices()[0].device_kind.lower()
    except Exception:
        return ""


def _vmem_params():
    """(working-set budget bytes, scoped vmem limit bytes) per TPU generation."""
    cap = None
    try:
        v = getattr(pltpu.get_tpu_info(), "vmem_capacity_bytes", None)
        if v:
            cap = int(v)
    except Exception:
        cap = None
    if not cap:
        kind = _device_kind()
        if kind and "7" not in kind:
            cap = 128 * 1024 * 1024          # v5e / v6e class
        else:
            cap = 64 * 1024 * 1024           # unknown / v7x: be conservative
    if cap <= 64 * 1024 * 1024:
        # v7x-class: 64 MiB physical VMEM per TensorCore.
        return 24 * 1024 * 1024, 48 * 1024 * 1024
    # v5e / v6e: 128 MiB physical VMEM -> use it.
    return 56 * 1024 * 1024, 104 * 1024 * 1024


def _megacore():
    """True on 2-TensorCore-per-chip parts (v7x)."""
    return "7" in _device_kind()


# ---------------------------------------------------------------------------
# VMEM working-set accounting (per node-row / fixed), used for tile sizing.
# ---------------------------------------------------------------------------

def _flat_vmem_row_bytes(flat_k, out_cols, itemsize):
    in_bytes = 2 * _round_up(flat_k, _LANE) * itemsize   # double-buffered input
    out_bytes = 2 * out_cols * itemsize                  # double-buffered output
    tmp = out_cols * 4                                   # f32 matmul accumulator
    return in_bytes + out_bytes + tmp


def _flat_vmem_fixed_bytes(flat_k, out_cols, itemsize, has_bias):
    fixed = 2 * _round_up(flat_k, _SUBLANE) * out_cols * itemsize  # tiled weight
    if has_bias:
        fixed += 2 * out_cols * itemsize
    return fixed + (1 << 20)                             # compiler scratch slack


def _agg_vmem_row_bytes(num_neighbors, input_dim, out_cols, itemsize):
    id_pad = _round_up(input_dim, _LANE)                 # lane padding of minor dim
    nn_pad = _round_up(num_neighbors, _SUBLANE)
    in_bytes = 2 * nn_pad * id_pad * itemsize            # double-buffered input
    out_bytes = 2 * out_cols * itemsize
    tmp = id_pad * 4 + out_cols * 4                      # f32 aggr + f32 matmul acc
    if itemsize < 4:
        if num_neighbors <= _DIRECT_REDUCE_MAX_NEIGHBORS:
            tmp += nn_pad * id_pad * 4                   # f32 upcast of whole tile
        else:
            tmp += (_NEIGHBOR_SLAB + 1) * id_pad * 4     # f32 slab upcast + slab sum
    return in_bytes + out_bytes + tmp


def _agg_vmem_fixed_bytes(input_dim, out_cols, itemsize, has_bias):
    fixed = 2 * _round_up(input_dim, _SUBLANE) * out_cols * itemsize
    if itemsize < 4:
        fixed += _round_up(input_dim, _SUBLANE) * out_cols * 4   # f32 weight promote
    if has_bias:
        fixed += 2 * out_cols * itemsize
    return fixed + (1 << 20)


def _pick_tile_nodes(num_nodes, row_bytes, fixed_bytes, budget_bytes):
    """Largest node tile (multiple of 8 sublanes, byte-driven, no artificial row
    cap) whose working set fits the per-generation VMEM budget."""
    avail = max(budget_bytes - fixed_bytes, row_bytes * _SUBLANE)
    tile = max(_SUBLANE, (avail // row_bytes) // _SUBLANE * _SUBLANE)
    return int(min(tile, _round_up(num_nodes, _SUBLANE)))


def _adjust_tile_for_megacore(num_nodes, tile, megacore):
    """On v7x make the node grid have an even number of steps (>=2) so the
    'parallel' axis keeps both TensorCores busy.  Only ever shrinks the tile."""
    if not megacore:
        return tile
    padded = _round_up(num_nodes, _SUBLANE)
    if padded < 2 * _SUBLANE:
        return tile                                      # cannot split one sublane group
    steps = _cdiv(num_nodes, tile)
    if steps >= 2 and steps % 2 == 0:
        return tile
    target = 2 if steps < 2 else steps + 1
    new_tile = _round_up(_cdiv(padded, target), _SUBLANE)
    return int(max(_SUBLANE, min(new_tile, tile)))


# ---------------------------------------------------------------------------
# Kernels
# ---------------------------------------------------------------------------

def _aggregate(nf_ref, aggr_method, num_neighbors):
    """Neighbor-axis reduce (axis=1) of the VMEM tile, accumulating in f32."""
    tile_n, _, input_dim = nf_ref.shape
    reduce_fn = jnp.max if aggr_method == "max" else jnp.sum
    itemsize = jnp.dtype(nf_ref.dtype).itemsize
    if itemsize >= 4 or num_neighbors <= _DIRECT_REDUCE_MAX_NEIGHBORS:
        # f32 inputs (no upcast copy) or small neighbor counts: one reduce.
        return reduce_fn(nf_ref[...].astype(jnp.float32), axis=1)

    # Sub-f32 inputs with many neighbors: reduce in 8-neighbor (one sublane-tile)
    # slabs with aligned dynamic slices, so only one slab is upcast to f32 at a
    # time; slab results are combined with cheap VPU ops.
    if aggr_method == "max":
        init = jnp.full((tile_n, input_dim), -jnp.inf, dtype=jnp.float32)
        combine = jnp.maximum
    else:
        init = jnp.zeros((tile_n, input_dim), dtype=jnp.float32)
        combine = jnp.add
    num_full = num_neighbors // _NEIGHBOR_SLAB
    rem = num_neighbors - num_full * _NEIGHBOR_SLAB

    def body(j, acc):
        start = pl.multiple_of(j * _NEIGHBOR_SLAB, _NEIGHBOR_SLAB)
        slab = nf_ref[:, pl.ds(start, _NEIGHBOR_SLAB), :].astype(jnp.float32)
        return combine(acc, reduce_fn(slab, axis=1))

    acc = lax.fori_loop(0, num_full, body, init, unroll=4)
    if rem:
        tail = nf_ref[:, pl.ds(num_full * _NEIGHBOR_SLAB, rem), :].astype(jnp.float32)
        acc = combine(acc, reduce_fn(tail, axis=1))
    return acc


def _agg_matmul_kernel(*refs, aggr_method, num_neighbors, scale, has_bias):
    # refs: nf (tile, nn, id), weight (id, out_cols), [bias (1, out_cols)], out.
    if has_bias:
        nf_ref, w_ref, b_ref, out_ref = refs
    else:
        nf_ref, w_ref, out_ref = refs
        b_ref = None
    aggr = _aggregate(nf_ref, aggr_method, num_neighbors)          # f32
    # Keep the LHS in f32 into the MXU so the f32 neighbor accumulation is not
    # rounded away for sub-f32 weights; the kernel is HBM-bound so the extra
    # MXU passes are hidden.
    acc = jnp.dot(aggr, w_ref[...].astype(jnp.float32),
                  preferred_element_type=jnp.float32)
    if scale != 1.0:
        acc = acc * scale                      # mean: fold 1/nn post-matmul (cheap)
    if b_ref is not None:
        acc = acc + b_ref[...].astype(jnp.float32)                 # fused bias
    out_ref[...] = acc.astype(out_ref.dtype)


def _flat_matmul_kernel(*refs, scale, has_bias):
    # refs: x (tile, nn*id), tiled weight (nn*id, out_cols), [bias], out.
    # Neighbor reduce is fused into the matmul: the (nn*id)-wide contraction with
    # the nn-times-tiled weight sums over neighbors in the MXU's f32 accumulator.
    if has_bias:
        x_ref, w_ref, b_ref, out_ref = refs
    else:
        x_ref, w_ref, out_ref = refs
        b_ref = None
    acc = jnp.dot(x_ref[...], w_ref[...], preferred_element_type=jnp.float32)
    if scale != 1.0:
        acc = acc * scale
    if b_ref is not None:
        acc = acc + b_ref[...].astype(jnp.float32)
    out_ref[...] = acc.astype(out_ref.dtype)


# ---------------------------------------------------------------------------
# Wrapper
# ---------------------------------------------------------------------------

def neighbor_aggregator(neighbor_feature, weight, bias=None, aggr_method="mean",
                        tile_nodes=None):
    """Pallas implementation of NeighborAggregator.forward.

    neighbor_feature: (num_nodes, num_neighbors, input_dim)
    weight:           (input_dim, output_dim)
    bias:             (output_dim,) or None
    """
    if aggr_method not in ("mean", "sum", "max"):
        raise ValueError(
            "Unknown aggr type, expected sum, max, or mean, but got {}".format(
                aggr_method))

    num_nodes, num_neighbors, input_dim = neighbor_feature.shape
    w_in, output_dim = weight.shape
    assert w_in == input_dim, "weight must be (input_dim, output_dim)"

    dtype = neighbor_feature.dtype
    itemsize = jnp.dtype(dtype).itemsize
    has_bias = bias is not None

    budget_bytes, vmem_limit = _vmem_params()
    megacore = _megacore()

    # Lane-dense output: pad output columns to a multiple of 128 (unmasked vst);
    # sliced back in the wrapper.
    out_cols = _round_up(output_dim, _LANE)
    if out_cols != output_dim:
        weight = jnp.pad(weight, ((0, 0), (0, out_cols - output_dim)))
        if has_bias:
            bias = jnp.pad(bias, (0, out_cols - output_dim))

    scale = 1.0 / num_neighbors if aggr_method == "mean" else 1.0
    flat_k = num_neighbors * input_dim

    # MXU-fused reduce path (sum/mean only, lane-unaligned input_dim).  Guarded
    # so the extra (x num_neighbors) matmul flops stay hidden under HBM traffic;
    # tighter output cap on v5e's weaker MXU.
    out_cols_cap = 128 if "v5" in _device_kind() else 512
    use_flat = (
        aggr_method in ("mean", "sum")
        and input_dim % _LANE != 0
        and flat_k <= 4096
        and out_cols <= out_cols_cap
        and 2 * _round_up(flat_k, _SUBLANE) * out_cols * itemsize <= budget_bytes // 3
    )

    if use_flat:
        x = neighbor_feature.reshape(num_nodes, flat_k)          # free for contiguous
        w_arg = jnp.tile(weight, (num_neighbors, 1))             # (nn*id, out_cols)
        row_bytes = _flat_vmem_row_bytes(flat_k, out_cols, itemsize)
        fixed_bytes = _flat_vmem_fixed_bytes(flat_k, out_cols, itemsize, has_bias)
        kernel = functools.partial(_flat_matmul_kernel, scale=scale,
                                   has_bias=has_bias)
        flops = 2 * num_nodes * flat_k * out_cols
        bytes_accessed = (num_nodes * flat_k * itemsize
                          + flat_k * out_cols * itemsize
                          + num_nodes * out_cols * itemsize)
    else:
        x = neighbor_feature
        w_arg = weight
        row_bytes = _agg_vmem_row_bytes(num_neighbors, input_dim, out_cols, itemsize)
        fixed_bytes = _agg_vmem_fixed_bytes(input_dim, out_cols, itemsize, has_bias)
        kernel = functools.partial(_agg_matmul_kernel, aggr_method=aggr_method,
                                   num_neighbors=num_neighbors, scale=scale,
                                   has_bias=has_bias)
        flops = (num_nodes * num_neighbors * input_dim
                 + 2 * num_nodes * input_dim * out_cols)
        bytes_accessed = (num_nodes * num_neighbors * input_dim * itemsize
                          + input_dim * out_cols * itemsize
                          + num_nodes * out_cols * itemsize)

    if tile_nodes is None:
        tile_nodes = _pick_tile_nodes(num_nodes, row_bytes, fixed_bytes, budget_bytes)
        tile_nodes = _adjust_tile_for_megacore(num_nodes, tile_nodes, megacore)
    else:
        tile_nodes = max(_SUBLANE, _round_up(int(tile_nodes), _SUBLANE))
        tile_nodes = min(tile_nodes, _round_up(num_nodes, _SUBLANE))
    grid = (_cdiv(num_nodes, tile_nodes),)

    if use_flat:
        in_specs = [
            pl.BlockSpec((tile_nodes, flat_k), lambda i: (i, 0)),
            pl.BlockSpec((flat_k, out_cols), lambda i: (0, 0)),
        ]
    else:
        in_specs = [
            pl.BlockSpec((tile_nodes, num_neighbors, input_dim), lambda i: (i, 0, 0)),
            pl.BlockSpec((input_dim, out_cols), lambda i: (0, 0)),
        ]
    args = [x, w_arg]
    if has_bias:
        bias2d = bias.reshape(1, out_cols).astype(w_arg.dtype)
        in_specs.append(pl.BlockSpec((1, out_cols), lambda i: (0, 0)))
        args.append(bias2d)

    out = pl.pallas_call(
        kernel,
        out_shape=jax.ShapeDtypeStruct((num_nodes, out_cols), dtype),
        grid=grid,
        in_specs=in_specs,
        out_specs=pl.BlockSpec((tile_nodes, out_cols), lambda i: (i, 0)),
        compiler_params=pltpu.CompilerParams(
            dimension_semantics=("parallel",),      # node tiles are independent
            vmem_limit_bytes=vmem_limit,
        ),
        cost_estimate=pl.CostEstimate(
            flops=int(flops), transcendentals=0,
            bytes_accessed=int(bytes_accessed)),
    )(*args)

    if out_cols != output_dim:
        out = out[:, :output_dim]
    return out


# ---------------------------------------------------------------------------
# Reference / init helpers + test harness
# ---------------------------------------------------------------------------

def init_weight(key, input_dim, output_dim, dtype=jnp.float32):
    """kaiming_uniform_ equivalent for a (input_dim, output_dim) tensor.

    PyTorch's kaiming_uniform_ (a=0, fan_in mode) on this 2-D tensor uses
    fan_in = tensor.size(1) == output_dim, gain = sqrt(2),
    bound = gain * sqrt(3 / fan_in).
    """
    fan_in = output_dim
    gain = math.sqrt(2.0)
    bound = gain * math.sqrt(3.0 / fan_in)
    return jax.random.uniform(
        key, (input_dim, output_dim), dtype=dtype, minval=-bound, maxval=bound)


def reference(neighbor_feature, weight, bias=None, aggr_method="mean"):
    if aggr_method == "mean":
        aggr = jnp.mean(neighbor_feature, axis=1)
    elif aggr_method == "sum":
        aggr = jnp.sum(neighbor_feature, axis=1)
    elif aggr_method == "max":
        aggr = jnp.max(neighbor_feature, axis=1)
    else:
        raise ValueError(aggr_method)
    out = aggr @ weight
    if bias is not None:
        out = out + bias
    return out


if __name__ == "__main__":
    key = jax.random.PRNGKey(0)
    k_x, k_w, k_b, k_x2, k_x3, k_w3 = jax.random.split(key, 6)

    num_nodes, num_neighbors = 16, 8
    input_dim, output_dim = 32, 16

    neighbor_feature = jax.random.normal(
        k_x, (num_nodes, num_neighbors, input_dim), dtype=jnp.float32)
    weight = init_weight(k_w, input_dim, output_dim)

    # Default module config: aggr_method="mean", use_bias=False (flat MXU path).
    out = neighbor_aggregator(neighbor_feature, weight, aggr_method="mean")
    out = jax.block_until_ready(out)
    ref = reference(neighbor_feature, weight, aggr_method="mean")
    assert out.shape == (num_nodes, output_dim)
    assert jnp.allclose(out, ref, atol=1e-5, rtol=1e-5), "mean mismatch vs reference"

    # Other aggregation modes ("sum" -> flat MXU path, "max" -> vector-reduce path).
    for method in ("sum", "max"):
        o = jax.block_until_ready(
            neighbor_aggregator(neighbor_feature, weight, aggr_method=method))
        r = reference(neighbor_feature, weight, aggr_method=method)
        assert jnp.allclose(o, r, atol=1e-5, rtol=1e-5), f"{method} mismatch"

    # use_bias=True + node count not divisible by the tile (partial last block).
    bias = 0.1 * jax.random.normal(k_b, (output_dim,), dtype=jnp.float32)
    nf2 = jax.random.normal(k_x2, (20, num_neighbors, input_dim), dtype=jnp.float32)
    o2 = jax.block_until_ready(
        neighbor_aggregator(nf2, weight, bias=bias, aggr_method="mean",
                            tile_nodes=8))
    r2 = reference(nf2, weight, bias=bias, aggr_method="mean")
    assert o2.shape == (20, output_dim)
    assert jnp.allclose(o2, r2, atol=1e-5, rtol=1e-5), "bias/partial-block mismatch"

    # Lane-aligned input_dim (multiple of 128) -> vector-reduce (non-flat) path.
    nf3 = jax.random.normal(k_x3, (16, num_neighbors, 128), dtype=jnp.float32)
    w3 = init_weight(k_w3, 128, output_dim)
    o3 = jax.block_until_ready(neighbor_aggregator(nf3, w3, aggr_method="mean"))
    r3 = reference(nf3, w3, aggr_method="mean")
    assert jnp.allclose(o3, r3, atol=1e-5, rtol=1e-5), "aligned-dim mean mismatch"

    print("KERNEL_OK")
</pallas_src>

<mosaic_0001>
module attributes {stable_mosaic.version = 11 : i64} {
  func.func @_flat_matmul_kernel(%arg0: i32, %arg1: memref<16x256xf32, #tpu.memory_space<vmem>>, %arg2: memref<256x128xf32, #tpu.memory_space<vmem>>, %arg3: memref<16x128xf32, #tpu.memory_space<vmem>>) attributes {dimension_semantics = [#tpu.dimension_semantics<parallel>], iteration_bounds = array<i64: 1>, scalar_prefetch = 0 : i64, scratch_operands = 0 : i64, tpu.core_type = #tpu.core_type<tc>, window_params = [{transform_indices = @transform_0, window_bounds = array<i64: 16, 256>}, {pipeline_mode = #tpu.pipeline_mode<synchronous>, transform_indices = @transform_1, window_bounds = array<i64: 256, 128>}, {transform_indices = @transform_2, window_bounds = array<i64: 16, 128>}]} {
    %c0 = arith.constant 0 : index
    %c0_0 = arith.constant 0 : index
    %0 = vector.load %arg1[%c0, %c0_0] : memref<16x256xf32, #tpu.memory_space<vmem>>, vector<16x256xf32>
    %c0_1 = arith.constant 0 : index
    %c0_2 = arith.constant 0 : index
    %1 = vector.load %arg2[%c0_1, %c0_2] : memref<256x128xf32, #tpu.memory_space<vmem>>, vector<256x128xf32>
    %cst = arith.constant dense<0.000000e+00> : vector<16x128xf32>
    %2 = tpu.matmul %0, %1, %cst {dimension_numbers = #tpu.dot_dimension_numbers<[1], [0], [0], [1], [0, 0, 1, 1], [], []>} : vector<16x256xf32>, vector<256x128xf32>, vector<16x128xf32> -> vector<16x128xf32>
    %cst_3 = arith.constant 1.250000e-01 : f32
    %3 = vector.broadcast %cst_3 : f32 to vector<16x128xf32>
    %4 = arith.mulf %2, %3 : vector<16x128xf32>
    %c0_4 = arith.constant 0 : index
    %c0_5 = arith.constant 0 : index
    %5 = vector.load %arg3[%c0_4, %c0_5] : memref<16x128xf32, #tpu.memory_space<vmem>>, vector<16x128xf32>
    tpu.vector_store %arg3[%c0_4, %c0_5], %4 {strides = array<i32>} : memref<16x128xf32, #tpu.memory_space<vmem>>, vector<16x128xf32>,
    return
  }
  func.func @transform_0(%arg0: i32) -> (i32, i32) {
    %c0_i32 = arith.constant 0 : i32
    %c0_i32_0 = arith.constant 0 : i32
    return %arg0, %c0_i32 : i32, i32
  }
  func.func @transform_1(%arg0: i32) -> (i32, i32) {
    %c0_i32 = arith.constant 0 : i32
    %c0_i32_0 = arith.constant 0 : i32
    %c0_i32_1 = arith.constant 0 : i32
    return %c0_i32, %c0_i32_0 : i32, i32
  }
  func.func @transform_2(%arg0: i32) -> (i32, i32) {
    %c0_i32 = arith.constant 0 : i32
    %c0_i32_0 = arith.constant 0 : i32
    return %arg0, %c0_i32 : i32, i32
  }
}

</mosaic_0001>

<bundles_post_ra>
// kernel: tpu_custom_call.1
= control target key start
LH: loop header
LB: loop body
LE: loop exit
PB: predicated region body
PF: predicated region fallthrough
CT: control target
= control target key end

     0   :  { %7 = vsyncpa [#allocation3], 0  ;;  %s304_s0 = inlined_call_operand.hbm [shape: f32[16,256], index: 0, kind: input, shape index: {}]   ;;  %s305_s1 = inlined_call_operand.hbm [shape: f32[256,128], index: 1, kind: input, shape index: {}]   ;;  %s306_s2 = inlined_call_operand.hbm [shape: f32[16,128], index: 2, kind: output, shape index: {}]  }
   0x1   :  { %8 = vsyncpa [#allocation6], 0 }
   0x2   :  { %9 = vsyncpa [#allocation4], 0  ;;  %s14_s11 = sshll.u32 %s304_s0, 4  ;;  %s267_s12 = smov [#allocation2]   ;;  %s15_s11 = int_to_ptr.hbm [resolvable:$true] %s14_s11 }
   0x3   :  { %s16_s13 = sshll.u32 %s267_s12, 4  ;;  %s27_s16 = sshll.u32 %s305_s1, 4  ;;  %s17_s13 = int_to_ptr.vmem [resolvable:$true] %s16_s13  ;;  %s28_s16 = int_to_ptr.hbm [resolvable:$true] %s27_s16 }
   0x4   :  { %s268_s17 = smov 256   ;;  %s269_s18 = smov 16  }
   0x5   :  { %22 = dma.hbm_to_vmem [thread:$0]  %s15_s11, 512, %s17_s13, [#allocation3], %s268_s17, %s268_s17, %s269_s18  }
   0x6   :  { %s270_s19 = smov [#allocation5]   ;;  %s271_s21 = smov 128  }
   0x7   :  { %s29_s20 = sshll.u32 %s270_s19, 4  ;;  %s272_s22 = smov 8   ;;  %s30_s20 = int_to_ptr.vmem [resolvable:$true] %s29_s20 }
   0x8   :  { %35 = dma.hbm_to_vmem [thread:$0]  %s28_s16, 4096, %s30_s20, [#allocation6], %s271_s21, %s271_s21, %s272_s22  }
   0x9   :  { %261 = dma.done.wait [#allocation3], 512  }
   0xa   :  { %262 = vsyncadd [#allocation3], 4294966784 }
   0xb   :  { %263 = dma.done.wait [#allocation6], 4096  }
   0xc   :  { %264 = vsyncadd [#allocation6], 4294963200  ;;  %v63_v0 = vld [vmem:[#allocation5 + $0x78] sm:$0xff]  ;;  %v62_v2 = vld [vmem:[#allocation5 + $0x70] sm:$0xff]  ;;  %s273_s0 = smov [#allocation7]   ;;  %s136_s25 = sshll.u32 %s306_s2, 4  ;;  %s137_s25 = int_to_ptr.hbm [resolvable:$true] %s136_s25 }
   0xd   :  { %v79_v1 = vld [vmem:[#allocation5 + $0xf8] sm:$0xff]  ;;  %150 = vmatpush.msra.mxu2 %v63_v0  ;;  %v78_v3 = vld [vmem:[#allocation5 + $0xf0] sm:$0xff]  ;;  %v61_v4 = vld [vmem:[#allocation5 + $0x68] sm:$0xff]  ;;  %80 = vmatpush.msra.mxu0 %v63_v0  ;;  %s134_s1 = sshll.u32 %s273_s0, 4  ;;  %s135_s1 = int_to_ptr.vmem [resolvable:$true] %s134_s1 }
   0xe   :  { %166 = vmatpush.msra.mxu3 %v79_v1  ;;  %v77_v5 = vld [vmem:[#allocation5 + $0xe8] sm:$0xff]  ;;  %103 = vmatpush.msra.mxu1 %v79_v1  ;;  %v60_v6 = vld [vmem:[#allocation5 + $0x60] sm:$0xff]  ;;  %v59_v8 = vld [vmem:[#allocation5 + $0x58] sm:$0xff] }
   0xf   :  { %151 = vmatpush.msra.mxu2 %v62_v2  ;;  %v76_v7 = vld [vmem:[#allocation5 + $0xe0] sm:$0xff]  ;;  %81 = vmatpush.msra.mxu0 %v62_v2  ;;  %v75_v9 = vld [vmem:[#allocation5 + $0xd8] sm:$0xff]  ;;  %v58_v10 = vld [vmem:[#allocation5 + $0x50] sm:$0xff] }
  0x10   :  { %167 = vmatpush.msra.mxu3 %v78_v3  ;;  %104 = vmatpush.msra.mxu1 %v78_v3  ;;  %v74_v11 = vld [vmem:[#allocation5 + $0xd0] sm:$0xff]  ;;  %v57_v12 = vld [vmem:[#allocation5 + $0x48] sm:$0xff]  ;;  %v56_v14 = vld [vmem:[#allocation5 + $0x40] sm:$0xff] }
  0x11   :  { %152 = vmatpush.msra.mxu2 %v61_v4  ;;  %82 = vmatpush.msra.mxu0 %v61_v4  ;;  %v73_v13 = vld [vmem:[#allocation5 + $0xc8] sm:$0xff]  ;;  %v72_v15 = vld [vmem:[#allocation5 + $0xc0] sm:$0xff]  ;;  %v55_v16 = vld [vmem:[#allocation5 + $0x38] sm:$0xff] }
  0x12   :  { %168 = vmatpush.msra.mxu3 %v77_v5  ;;  %105 = vmatpush.msra.mxu1 %v77_v5  ;;  %v71_v17 = vld [vmem:[#allocation5 + $0xb8] sm:$0xff]  ;;  %v54_v18 = vld [vmem:[#allocation5 + $0x30] sm:$0xff]  ;;  %v53_v20 = vld [vmem:[#allocation5 + $0x28] sm:$0xff] }
  0x13   :  { %153 = vmatpush.msra.mxu2 %v60_v6  ;;  %83 = vmatpush.msra.mxu0 %v60_v6  ;;  %v70_v19 = vld [vmem:[#allocation5 + $0xb0] sm:$0xff]  ;;  %v69_v21 = vld [vmem:[#allocation5 + $0xa8] sm:$0xff]  ;;  %v52_v22 = vld [vmem:[#allocation5 + $0x20] sm:$0xff] }
  0x14   :  { %169 = vmatpush.msra.mxu3 %v76_v7  ;;  %106 = vmatpush.msra.mxu1 %v76_v7  ;;  %v68_v23 = vld [vmem:[#allocation5 + $0xa0] sm:$0xff]  ;;  %v51_v24 = vld [vmem:[#allocation5 + $0x18] sm:$0xff]  ;;  %v50_v26 = vld [vmem:[#allocation5 + $0x10] sm:$0xff] }
  0x15   :  { %154 = vmatpush.msra.mxu2 %v59_v8  ;;  %84 = vmatpush.msra.mxu0 %v59_v8  ;;  %v67_v25 = vld [vmem:[#allocation5 + $0x98] sm:$0xff]  ;;  %v66_v27 = vld [vmem:[#allocation5 + $0x90] sm:$0xff]  ;;  %v49_v28 = vld [vmem:[#allocation5 + $0x8] sm:$0xff] }
  0x16   :  { %170 = vmatpush.msra.mxu3 %v75_v9  ;;  %107 = vmatpush.msra.mxu1 %v75_v9  ;;  %v65_v29 = vld [vmem:[#allocation5 + $0x88] sm:$0xff]  ;;  %v48_v30 = vld [vmem:[#allocation5] sm:$0xff]  ;;  %v46_v32 = vld [vmem:[#allocation2 + $0x10] sm:$0xff] }
  0x17   :  { %155 = vmatpush.msra.mxu2 %v58_v10  ;;  %85 = vmatpush.msra.mxu0 %v58_v10  ;;  %v64_v31 = vld [vmem:[#allocation5 + $0x80] sm:$0xff]  ;;  %v47_v33 = vld [vmem:[#allocation2 + $0x18] sm:$0xff]  ;;  %v45_v35 = vld [vmem:[#allocation2 + $0x8] sm:$0xff] }
  0x18   :  { %171 = vmatpush.msra.mxu3 %v74_v11  ;;  %108 = vmatpush.msra.mxu1 %v74_v11  ;;  %v44_v34 = vld [vmem:[#allocation2] sm:$0xff] }
  0x19   :  { %156 = vmatpush.msra.mxu2 %v57_v12  ;;  %86 = vmatpush.msra.mxu0 %v57_v12 }
  0x1a   :  { %172 = vmatpush.msra.mxu3 %v73_v13  ;;  %109 = vmatpush.msra.mxu1 %v73_v13 }
  0x1b   :  { %157 = vmatpush.msra.mxu2 %v56_v14  ;;  %87 = vmatpush.msra.mxu0 %v56_v14 }
  0x1c   :  { %173 = vmatpush.msra.mxu3 %v72_v15  ;;  %110 = vmatpush.msra.mxu1 %v72_v15 }
  0x1d   :  { %158 = vmatpush.msra.mxu2 %v55_v16  ;;  %88 = vmatpush.msra.mxu0 %v55_v16 }
  0x1e   :  { %174 = vmatpush.msra.mxu3 %v71_v17  ;;  %111 = vmatpush.msra.mxu1 %v71_v17 }
  0x1f   :  { %159 = vmatpush.msra.mxu2 %v54_v18  ;;  %89 = vmatpush.msra.mxu0 %v54_v18 }
  0x20   :  { %175 = vmatpush.msra.mxu3 %v70_v19  ;;  %112 = vmatpush.msra.mxu1 %v70_v19 }
  0x21   :  { %160 = vmatpush.msra.mxu2 %v53_v20  ;;  %90 = vmatpush.msra.mxu0 %v53_v20 }
  0x22   :  { %176 = vmatpush.msra.mxu3 %v69_v21  ;;  %113 = vmatpush.msra.mxu1 %v69_v21 }
  0x23   :  { %161 = vmatpush.msra.mxu2 %v52_v22  ;;  %91 = vmatpush.msra.mxu0 %v52_v22 }
  0x24   :  { %177 = vmatpush.msra.mxu3 %v68_v23  ;;  %114 = vmatpush.msra.mxu1 %v68_v23 }
  0x25   :  { %162 = vmatpush.msra.mxu2 %v51_v24  ;;  %92 = vmatpush.msra.mxu0 %v51_v24 }
  0x26   :  { %178 = vmatpush.msra.mxu3 %v67_v25  ;;  %115 = vmatpush.msra.mxu1 %v67_v25 }
  0x27   :  { %163 = vmatpush.msra.mxu2 %v50_v26  ;;  %93 = vmatpush.msra.mxu0 %v50_v26 }
  0x28   :  { %179 = vmatpush.msra.mxu3 %v66_v27  ;;  %116 = vmatpush.msra.mxu1 %v66_v27 }
  0x29   :  { %164 = vmatpush.msra.mxu2 %v49_v28  ;;  %94 = vmatpush.msra.mxu0 %v49_v28 }
  0x2a   :  { %180 = vmatpush.msra.mxu3 %v65_v29  ;;  %117 = vmatpush.msra.mxu1 %v65_v29 }
  0x2b   :  { %165 = vmatpush.msra.mxu2 %v48_v30  ;;  %95 = vmatpush.msra.mxu0 %v48_v30 }
  0x2c   :  { %181 = vmatpush.msra.mxu3 %v64_v31  ;;  %99 = vmatmul.f32.vlgmr.msra.gmra.mxu2 %v46_v32 }
  0x2d   :  { %122 = vmatmul.f32.vlgmr.msra.gmra.mxu3 %v47_v33  ;;  %118 = vmatpush.msra.mxu1 %v64_v31 }
  0x2e   :  { %96 = vmatmul.f32.vlgmr.msra.gmra.mxu0 %v44_v34  ;;  %119 = vmatmul.f32.vlgmr.msra.gmra.mxu1 %v45_v35 }
  0xab   :  { %v97_v36 = vpop.f32.mrf.mxu0  ;;  %v120_v37 = vpop.f32.mrf.mxu1 }
  0xac   :  { %v121_v38 = vadd.f32 %v120_v37, %v97_v36 }
  0xae   :  { %v126_v39 = vmul.f32 0.125, %v121_v38 }
  0xaf   :  { %v100_v40 = vpop.f32.mrf.mxu2 }
  0xb0   :  { %v123_v41 = vpop.f32.mrf.mxu3  ;;  %128 = vst [vmem:[#allocation7] sm:$0xff] %v126_v39 }
  0xb1   :  { %v124_v42 = vadd.f32 %v123_v41, %v100_v40 }
  0xb3   :  { %v127_v43 = vmul.f32 0.125, %v124_v42 }
  0xb5   :  { %129 = vst [vmem:[#allocation7 + $0x8] sm:$0xff] %v127_v43 }
  0xb6   :  { %142 = dma.vmem_to_hbm [thread:$0]  %s135_s1, 256, %s137_s25, [#allocation4], %s271_s21, %s271_s21, %s272_s22  }
  0xb7   :  { %265 = dma.done.wait [#allocation4], 256  }
  0xb8   :  { %266 = vsyncadd [#allocation4], 4294967040 }
  0xb9   :  { %147 = vsyncpa [#allocation3], 1 }
  0xba   :  { %148 = vsyncpa [#allocation6], 1 }
  0xbb   :  { %149 = vsyncpa [#allocation4], 1 }

</bundles_post_ra>
